<compile_context>
chip_gen: v6e
topology: v6e:2x2x1
jax: 0.10.0
libtpu: 0.0.40
codegen_flags: <defaults>
</compile_context>

<pallas_src>
import jax
import jax.numpy as jnp
from jax.experimental import pallas as pl
from jax.experimental.pallas import tpu as pltpu

LANE = 128      # lane width / MXU tile edge
SUBLANE = 8     # f32 sublanes per vreg


def _round_up(n: int, m: int) -> int:
    return ((n + m - 1) // m) * m


def mlp_kernel(x_ref, w1_ref, b1_ref, w2_ref, b2_ref, o_ref):
    # In-kernel cast of x to the weight dtype (no-op for f32 params, bf16 MXU path
    # otherwise) -- avoids a separate XLA convert op per forward call.
    xv = x_ref[...].astype(w1_ref.dtype)
    # fc1 on the MXU, f32 accumulation; bias add + ReLU fused on the VPU in VMEM.
    h = jnp.dot(xv, w1_ref[...], preferred_element_type=jnp.float32)
    h = jnp.maximum(h + b1_ref[...], 0.0)                  # (TM, H_pad) + (1, H_pad)
    # fc2 on the MXU (single cast of h to the weight dtype).
    out = jnp.dot(h.astype(w2_ref.dtype), w2_ref[...],
                  preferred_element_type=jnp.float32)
    o_ref[...] = (out + b2_ref[...]).astype(o_ref.dtype)   # (TM, C_pad) + (1, C_pad)


def prepare_params(w1, b1, w2, b2, *, compute_dtype=None):
    """One-time parameter prep (hoisted out of the forward pass).

    w1: (K, H); b1: (H,) or (1, H); w2: (H, C); b2: (C,) or (1, C)
    Pads H and C to lane-dense multiples of 128 (exact: relu(0+0)=0 and the padded
    W2 rows are zero) and optionally casts W1/W2 to `compute_dtype` (e.g. bf16 for
    the v6e/v7x MXU fast path). Biases stay f32.
    """
    K, H = w1.shape
    C = w2.shape[1]
    H_pad = _round_up(H, LANE)
    C_pad = _round_up(C, LANE)

    if compute_dtype is not None:
        w1 = w1.astype(compute_dtype)
        w2 = w2.astype(compute_dtype)

    w1p = jnp.pad(w1, ((0, 0), (0, H_pad - H)))
    b1p = jnp.pad(b1.astype(jnp.float32).reshape(1, H), ((0, 0), (0, H_pad - H)))
    w2p = jnp.pad(w2, ((0, H_pad - H), (0, C_pad - C)))
    b2p = jnp.pad(b2.astype(jnp.float32).reshape(1, C), ((0, 0), (0, C_pad - C)))
    return w1p, b1p, w2p, b2p


def neural_network_forward(x, params, *, num_classes=None, block_m=512,
                           out_dtype=None):
    """relu(x @ W1 + b1) @ W2 + b2 with pre-prepared (padded) params.

    x: (B, K); params = prepare_params(...).
    Returns (B, num_classes) if num_classes is given, else (B, C_pad) lane-padded
    logits (padded columns are exactly b2's padding, i.e. zero).
    """
    w1p, b1p, w2p, b2p = params
    B, K = x.shape
    H_pad = w1p.shape[1]
    C_pad = w2p.shape[1]
    if out_dtype is None:
        out_dtype = x.dtype

    # Batch tile: sublane-aligned, capped at block_m (256-1024 amortizes the
    # ~0.35 us per-grid-step overhead), and chosen so there are >= 2 grid steps
    # whenever B allows -- keeps both v7x TensorCores busy via the "parallel" axis.
    TM = max(SUBLANE, min(block_m, _round_up(pl.cdiv(B, 2), SUBLANE)))
    grid_m = pl.cdiv(B, TM)   # ragged last block handled by Pallas (masked writes)

    flops = 2 * B * (K * H_pad + H_pad * C_pad)
    bytes_accessed = (x.size * x.dtype.itemsize
                      + sum(int(a.size) * a.dtype.itemsize
                            for a in (w1p, b1p, w2p, b2p))
                      + B * C_pad * jnp.dtype(out_dtype).itemsize)

    out_pad = pl.pallas_call(
        mlp_kernel,
        out_shape=jax.ShapeDtypeStruct((B, C_pad), out_dtype),
        grid=(grid_m,),
        in_specs=[
            pl.BlockSpec((TM, K), lambda i: (i, 0)),         # x: batch-tiled
            pl.BlockSpec((K, H_pad), lambda i: (0, 0)),      # W1: VMEM-resident
            pl.BlockSpec((1, H_pad), lambda i: (0, 0)),      # b1: VMEM-resident
            pl.BlockSpec((H_pad, C_pad), lambda i: (0, 0)),  # W2: VMEM-resident
            pl.BlockSpec((1, C_pad), lambda i: (0, 0)),      # b2: VMEM-resident
        ],
        out_specs=pl.BlockSpec((TM, C_pad), lambda i: (i, 0)),
        compiler_params=pltpu.CompilerParams(
            dimension_semantics=("parallel",)),              # batch tiles independent
        cost_estimate=pl.CostEstimate(
            flops=flops, transcendentals=0, bytes_accessed=bytes_accessed),
    )(x, w1p, b1p, w2p, b2p)

    if num_classes is not None and num_classes != C_pad:
        return out_pad[:, :num_classes]
    return out_pad


def init_params(key, input_size, hidden_size, num_classes, dtype=jnp.float32):
    """Deterministic PyTorch-style init: U(-1/sqrt(fan_in), 1/sqrt(fan_in))."""
    k1, k2, k3, k4 = jax.random.split(key, 4)
    bound1 = 1.0 / jnp.sqrt(float(input_size))
    bound2 = 1.0 / jnp.sqrt(float(hidden_size))
    # stored as (in_features, out_features) -- transposed vs. torch's (out, in)
    w1 = jax.random.uniform(k1, (input_size, hidden_size), dtype, -bound1, bound1)
    b1 = jax.random.uniform(k2, (1, hidden_size), dtype, -bound1, bound1)
    w2 = jax.random.uniform(k3, (hidden_size, num_classes), dtype, -bound2, bound2)
    b2 = jax.random.uniform(k4, (1, num_classes), dtype, -bound2, bound2)
    return w1, b1, w2, b2


if __name__ == "__main__":
    # Shapes consistent with the script: input_vectors -> (batch, input_size)
    input_size = 16      # num_components (PCA) + optimized-feature width (synthetic)
    hidden_size = 100    # matches the script's hidden_size
    num_classes = 10     # matches the script's num_classes

    # TODO(synk): the EMG preprocessing (filtfilt, feature extraction, PSO clustering,
    # PCA) is host-side data prep outside the nn.Module forward and is not kernelized.

    key = jax.random.PRNGKey(0)
    kx, kp = jax.random.split(key)
    w1, b1, w2, b2 = init_params(kp, input_size, hidden_size, num_classes)

    # One-time parameter prep (pad/cast hoisted out of the per-call forward).
    params_f32 = prepare_params(w1, b1, w2, b2)                               # exact
    params_bf16 = prepare_params(w1, b1, w2, b2, compute_dtype=jnp.bfloat16)  # fast path

    def ref_fn(x):
        return jnp.maximum(x @ w1 + b1, 0.0) @ w2 + b2

    # 1) small batch (as in the script), f32 end-to-end, single tile
    x_small = jax.random.normal(kx, (8, input_size), jnp.float32)
    out = jax.block_until_ready(
        neural_network_forward(x_small, params_f32, num_classes=num_classes))
    assert out.shape == (8, num_classes)
    assert jnp.allclose(out, ref_fn(x_small), atol=1e-5, rtol=1e-5)

    # 2) multi-tile batch with a ragged last block (grid=2, masked edge writes), f32
    x_mid = jax.random.normal(kx, (200, input_size), jnp.float32)
    out_mid = jax.block_until_ready(
        neural_network_forward(x_mid, params_f32, num_classes=num_classes))
    assert out_mid.shape == (200, num_classes)
    assert jnp.allclose(out_mid, ref_fn(x_mid), atol=1e-5, rtol=1e-5)

    # 3) bf16 weight storage (v6e/v7x MXU fast path), f32 accumulation -- looser tol
    x_big = jax.random.normal(kx, (256, input_size), jnp.float32)
    out_bf16 = jax.block_until_ready(
        neural_network_forward(x_big, params_bf16, num_classes=num_classes))
    assert out_bf16.shape == (256, num_classes)
    assert jnp.allclose(out_bf16, ref_fn(x_big), atol=5e-2, rtol=5e-2)

    # 4) bf16 output storage (halves the largest per-step DMA), lane-padded logits
    out_pad_bf16 = jax.block_until_ready(
        neural_network_forward(x_big, params_bf16, out_dtype=jnp.bfloat16))
    assert out_pad_bf16.shape == (256, 128) and out_pad_bf16.dtype == jnp.bfloat16
    assert jnp.allclose(out_pad_bf16[:, :num_classes].astype(jnp.float32),
                        ref_fn(x_big), atol=1e-1, rtol=1e-1)

    print("KERNEL_OK")
</pallas_src>

<mosaic_0001>
module attributes {stable_mosaic.version = 11 : i64} {
  func.func @mlp_kernel(%arg0: i32, %arg1: memref<8x16xf32, #tpu.memory_space<vmem>>, %arg2: memref<16x128xf32, #tpu.memory_space<vmem>>, %arg3: memref<1x128xf32, #tpu.memory_space<vmem>>, %arg4: memref<128x128xf32, #tpu.memory_space<vmem>>, %arg5: memref<1x128xf32, #tpu.memory_space<vmem>>, %arg6: memref<8x128xf32, #tpu.memory_space<vmem>>) attributes {dimension_semantics = [#tpu.dimension_semantics<parallel>], iteration_bounds = array<i64: 1>, scalar_prefetch = 0 : i64, scratch_operands = 0 : i64, tpu.core_type = #tpu.core_type<tc>, window_params = [{transform_indices = @transform_0, window_bounds = array<i64: 8, 16>}, {pipeline_mode = #tpu.pipeline_mode<synchronous>, transform_indices = @transform_1, window_bounds = array<i64: 16, 128>}, {pipeline_mode = #tpu.pipeline_mode<synchronous>, transform_indices = @transform_2, window_bounds = array<i64: 1, 128>}, {pipeline_mode = #tpu.pipeline_mode<synchronous>, transform_indices = @transform_3, window_bounds = array<i64: 128, 128>}, {pipeline_mode = #tpu.pipeline_mode<synchronous>, transform_indices = @transform_4, window_bounds = array<i64: 1, 128>}, {transform_indices = @transform_5, window_bounds = array<i64: 8, 128>}]} {
    %c0 = arith.constant 0 : index
    %c0_0 = arith.constant 0 : index
    %0 = vector.load %arg1[%c0, %c0_0] : memref<8x16xf32, #tpu.memory_space<vmem>>, vector<8x16xf32>
    %c0_1 = arith.constant 0 : index
    %c0_2 = arith.constant 0 : index
    %1 = vector.load %arg2[%c0_1, %c0_2] : memref<16x128xf32, #tpu.memory_space<vmem>>, vector<16x128xf32>
    %cst = arith.constant dense<0.000000e+00> : vector<8x128xf32>
    %2 = tpu.matmul %0, %1, %cst {dimension_numbers = #tpu.dot_dimension_numbers<[1], [0], [0], [1], [0, 0, 1, 1], [], []>} : vector<8x16xf32>, vector<16x128xf32>, vector<8x128xf32> -> vector<8x128xf32>
    %c0_3 = arith.constant 0 : index
    %c0_4 = arith.constant 0 : index
    %3 = vector.load %arg3[%c0_3, %c0_4] : memref<1x128xf32, #tpu.memory_space<vmem>>, vector<1x128xf32>
    %4 = vector.broadcast %3 : vector<1x128xf32> to vector<8x128xf32>
    %5 = arith.addf %2, %4 : vector<8x128xf32>
    %cst_5 = arith.constant 0.000000e+00 : f32
    %6 = vector.broadcast %cst_5 : f32 to vector<8x128xf32>
    %7 = arith.maximumf %5, %6 : vector<8x128xf32>
    %c0_6 = arith.constant 0 : index
    %c0_7 = arith.constant 0 : index
    %8 = vector.load %arg4[%c0_6, %c0_7] : memref<128x128xf32, #tpu.memory_space<vmem>>, vector<128x128xf32>
    %cst_8 = arith.constant dense<0.000000e+00> : vector<8x128xf32>
    %9 = tpu.matmul %7, %8, %cst_8 {dimension_numbers = #tpu.dot_dimension_numbers<[1], [0], [0], [1], [0, 0, 1, 1], [], []>} : vector<8x128xf32>, vector<128x128xf32>, vector<8x128xf32> -> vector<8x128xf32>
    %c0_9 = arith.constant 0 : index
    %c0_10 = arith.constant 0 : index
    %10 = vector.load %arg5[%c0_9, %c0_10] : memref<1x128xf32, #tpu.memory_space<vmem>>, vector<1x128xf32>
    %11 = vector.broadcast %10 : vector<1x128xf32> to vector<8x128xf32>
    %12 = arith.addf %9, %11 : vector<8x128xf32>
    %c0_11 = arith.constant 0 : index
    %c0_12 = arith.constant 0 : index
    %13 = vector.load %arg6[%c0_11, %c0_12] : memref<8x128xf32, #tpu.memory_space<vmem>>, vector<8x128xf32>
    tpu.vector_store %arg6[%c0_11, %c0_12], %12 {strides = array<i32>} : memref<8x128xf32, #tpu.memory_space<vmem>>, vector<8x128xf32>,
    return
  }
  func.func @transform_0(%arg0: i32) -> (i32, i32) {
    %c0_i32 = arith.constant 0 : i32
    %c0_i32_0 = arith.constant 0 : i32
    return %arg0, %c0_i32 : i32, i32
  }
  func.func @transform_1(%arg0: i32) -> (i32, i32) {
    %c0_i32 = arith.constant 0 : i32
    %c0_i32_0 = arith.constant 0 : i32
    %c0_i32_1 = arith.constant 0 : i32
    return %c0_i32, %c0_i32_0 : i32, i32
  }
  func.func @transform_2(%arg0: i32) -> (i32, i32) {
    %c0_i32 = arith.constant 0 : i32
    %c0_i32_0 = arith.constant 0 : i32
    %c0_i32_1 = arith.constant 0 : i32
    return %c0_i32, %c0_i32_0 : i32, i32
  }
  func.func @transform_3(%arg0: i32) -> (i32, i32) {
    %c0_i32 = arith.constant 0 : i32
    %c0_i32_0 = arith.constant 0 : i32
    %c0_i32_1 = arith.constant 0 : i32
    return %c0_i32, %c0_i32_0 : i32, i32
  }
  func.func @transform_4(%arg0: i32) -> (i32, i32) {
    %c0_i32 = arith.constant 0 : i32
    %c0_i32_0 = arith.constant 0 : i32
    %c0_i32_1 = arith.constant 0 : i32
    return %c0_i32, %c0_i32_0 : i32, i32
  }
  func.func @transform_5(%arg0: i32) -> (i32, i32) {
    %c0_i32 = arith.constant 0 : i32
    %c0_i32_0 = arith.constant 0 : i32
    return %arg0, %c0_i32 : i32, i32
  }
}

</mosaic_0001>

<bundles_post_ra>
// kernel: tpu_custom_call.1
= control target key start
LH: loop header
LB: loop body
LE: loop exit
PB: predicated region body
PF: predicated region fallthrough
CT: control target
= control target key end

     0   :  { %10 = vsyncpa [#allocation3], 0  ;;  %s470_s0 = inlined_call_operand.hbm [shape: f32[8,16], index: 0, kind: input, shape index: {}]   ;;  %s471_s1 = inlined_call_operand.hbm [shape: f32[16,128], index: 1, kind: input, shape index: {}]   ;;  %s472_s2 = inlined_call_operand.vmem [shape: f32[1,128], index: 2, kind: input, shape index: {}]   ;;  %s473_s3 = inlined_call_operand.hbm [shape: f32[128,128], index: 3, kind: input, shape index: {}]   ;;  %s474_s4 = inlined_call_operand.vmem [shape: f32[1,128], index: 4, kind: input, shape index: {}]   ;;  %s475_s5 = inlined_call_operand.hbm [shape: f32[8,128], index: 5, kind: output, shape index: {}]  }
   0x1   :  { %11 = vsyncpa [#allocation6], 0 }
   0x2   :  { %12 = vsyncpa [#allocation4], 0  ;;  %s414_s18 = smov [#allocation5]  }
   0x3   :  { %s28_s19 = sshll.u32 %s414_s18, 4  ;;  %s29_s19 = int_to_ptr.vmem [resolvable:$true] %s28_s19 }
   0x4   :  { %s336_s20 = scalar_lea.vmem %s29_s19, 256  ;;  %p341_p1 = scmp.lt.s32.totalorder %s29_s19, %s29_s19 }
   0x5   :  { %p337_p0 = scmp.ne.s32.totalorder %s29_s19, %s336_s20  ;;  %p342_p2 = scmp.lt.s32.totalorder %s336_s20, %s336_s20 }
   0x7   :  { %p343_p3 = por %p342_p2, %p341_p1 }
   0x9   :  { %p344_p4 = pnand %p343_p3, %p337_p0 }
   0xb   :  { %347 = shalt.err (!%p344_p4)
}
   0xc   :  { %s415_s21 = smov 128   ;;  %s416_s22 = smov 8  }
   0xd   :  { %34 = dma.hbm_to_vmem [thread:$0]  %s471_s1, 256, %s29_s19, [#allocation6], %s415_s21, %s415_s21, %s416_s22  }
   0xe   :  { %s417_s25 = smov [#allocation2]   ;;  %s418_s27 = smov [#allocation7]  }
   0xf   :  { %s19_s26 = sshll.u32 %s417_s25, 4  ;;  %s42_s28 = sshll.u32 %s418_s27, 4  ;;  %s20_s26 = int_to_ptr.vmem [resolvable:$true] %s19_s26  ;;  %s43_s28 = int_to_ptr.vmem [resolvable:$true] %s42_s28 }
  0x10   :  { %s356_s29 = scalar_lea.vmem %s20_s26, 128  ;;  %p361_p6 = scmp.lt.s32.totalorder %s20_s26, %s20_s26 }
  0x11   :  { %p357_p5 = scmp.ne.s32.totalorder %s20_s26, %s356_s29  ;;  %p362_p7 = scmp.lt.s32.totalorder %s356_s29, %s356_s29 }
  0x13   :  { %p363_p8 = por %p362_p7, %p361_p6 }
  0x15   :  { %p364_p9 = pnand %p363_p8, %p357_p5 }
  0x17   :  { %367 = shalt.err (!%p364_p9)
}
  0x18   :  { %22 = dma.hbm_to_vmem [thread:$0]  %s470_s0, 128, %s20_s26, [#allocation3]  }
  0x19   :  { %s376_s7 = scalar_lea.vmem %s43_s28, 2048  ;;  %p381_p11 = scmp.lt.s32.totalorder %s43_s28, %s43_s28 }
  0x1a   :  { %p377_p10 = scmp.ne.s32.totalorder %s43_s28, %s376_s7  ;;  %p382_p12 = scmp.lt.s32.totalorder %s376_s7, %s376_s7 }
  0x1c   :  { %p383_p13 = por %p382_p12, %p381_p11 }
  0x1e   :  { %p384_p0 = pnand %p383_p13, %p377_p10 }
  0x20   :  { %387 = shalt.err (!%p384_p0)
}
  0x21   :  { %48 = dma.hbm_to_vmem [thread:$0]  %s473_s3, 2048, %s43_s28, [#allocation6], %s415_s21, %s415_s21, %s416_s22  }
  0x22   :  { %408 = dma.done.wait [#allocation3], 128  }
  0x23   :  { %409 = vsyncadd [#allocation3], 4294967168 }
  0x24   :  { %410 = dma.done.wait [#allocation6], 2304  }
  0x25   :  { %411 = vsyncadd [#allocation6], 4294964992  ;;  %v419_v0 = vmov 0.0   ;;  %vm420_vm0 = vmmov 0   ;;  %v62_v1 = vld [vmem:[#allocation5 + $0x8] sm:$0xff]  ;;  %v61_v2 = vld [vmem:[#allocation5] sm:$0xff] }
  0x26   :  { %278 = vmatprep.subr.mxu0 %v419_v0  ;;  %282 = vmatprep.mubr.msk.f32.mxu0 %vm420_vm0, %v419_v0  ;;  %v60_v3 = vld [vmem:[#allocation2] sm:$0xff]  ;;  %vm70_vm1 = vcmask 130048   ;;  %v160_v4 = vld [vmem:[#allocation7 + $0x78] sm:$0xff]  ;;  %v159_v5 = vld [vmem:[#allocation7 + $0x70] sm:$0xff]  ;;  %s421_s11 = smov [#allocation8]  }
  0x27   :  { %285 = vmatprep.subr.mxu1 %v419_v0  ;;  %317 = vmatprep.mubr.msk.f32.mxu1 %vm420_vm0, %v419_v0  ;;  %v158_v6 = vld [vmem:[#allocation7 + $0x68] sm:$0xff]  ;;  %v157_v7 = vld [vmem:[#allocation7 + $0x60] sm:$0xff]  ;;  %v156_v8 = vld [vmem:[#allocation7 + $0x58] sm:$0xff]  ;;  %s245_s12 = sshll.u32 %s421_s11, 4  ;;  %s246_s12 = int_to_ptr.vmem [resolvable:$true] %s245_s12 }
  0x28   :  { %279 = vmatpush3.msra.mxu0 %v62_v1  ;;  %286 = vmatpush3.msra.mxu1 %v160_v4  ;;  %v155_v9 = vld [vmem:[#allocation7 + $0x50] sm:$0xff]  ;;  %v154_v10 = vld [vmem:[#allocation7 + $0x48] sm:$0xff]  ;;  %v153_v11 = vld [vmem:[#allocation7 + $0x40] sm:$0xff]  ;;  %s388_s13 = scalar_lea.vmem %s246_s12, 128  ;;  %p393_p2 = scmp.lt.s32.totalorder %s246_s12, %s246_s12 }
  0x29   :  { %280 = vmatprep.subr.mxu0 %v419_v0  ;;  %287 = vmatprep.subr.mxu1 %v419_v0  ;;  %v152_v12 = vld [vmem:[#allocation7 + $0x38] sm:$0xff]  ;;  %v151_v13 = vld [vmem:[#allocation7 + $0x30] sm:$0xff]  ;;  %v150_v14 = vld [vmem:[#allocation7 + $0x28] sm:$0xff]  ;;  %p389_p1 = scmp.ne.s32.totalorder %s246_s12, %s388_s13  ;;  %p394_p3 = scmp.lt.s32.totalorder %s388_s13, %s388_s13 }
  0x2a   :  { %281 = vmatpush3.msra.mxu0 %v61_v2  ;;  %288 = vmatpush3.msra.mxu1 %v159_v5  ;;  %v149_v15 = vld [vmem:[#allocation7 + $0x20] sm:$0xff]  ;;  %v148_v16 = vld [vmem:[#allocation7 + $0x18] sm:$0xff]  ;;  %v147_v17 = vld [vmem:[#allocation7 + $0x10] sm:$0xff] }
  0x2b   :  { %283 = vmatmul.mubr.msk.f32.vlgmr.msra.gmra.mxu0 %vm70_vm1, %v60_v3  ;;  %289 = vmatprep.subr.mxu1 %v419_v0  ;;  %v146_v18 = vld [vmem:[#allocation7 + $0x8] sm:$0xff]  ;;  %v145_v19 = vld [vmem:[#allocation7] sm:$0xff]  ;;  %p395_p4 = por %p394_p3, %p393_p2 }
  0x2c   :  { %290 = vmatpush3.msra.mxu1 %v158_v6  ;;  %v255_v20 = vld [vmem:[%s472_s2] ss:$0 sm:$0xff] }
  0x2d   :  { %291 = vmatprep.subr.mxu1 %v419_v0  ;;  %v257_v25 = vld [vmem:[%s474_s4] ss:$0 sm:$0xff]  ;;  %p396_p5 = pnand %p395_p4, %p389_p1 }
  0x2e   :  { %292 = vmatpush3.msra.mxu1 %v157_v7 }
  0x2f   :  { %293 = vmatprep.subr.mxu1 %v419_v0 }
  0x30   :  { %294 = vmatpush3.msra.mxu1 %v156_v8 }
  0x31   :  { %295 = vmatprep.subr.mxu1 %v419_v0 }
  0x32   :  { %296 = vmatpush3.msra.mxu1 %v155_v9 }
  0x33   :  { %297 = vmatprep.subr.mxu1 %v419_v0 }
  0x34   :  { %298 = vmatpush3.msra.mxu1 %v154_v10 }
  0x35   :  { %299 = vmatprep.subr.mxu1 %v419_v0 }
  0x36   :  { %300 = vmatpush3.msra.mxu1 %v153_v11 }
  0x37   :  { %301 = vmatprep.subr.mxu1 %v419_v0 }
  0x38   :  { %302 = vmatpush3.msra.mxu1 %v152_v12 }
  0x39   :  { %303 = vmatprep.subr.mxu1 %v419_v0 }
  0x3a   :  { %304 = vmatpush3.msra.mxu1 %v151_v13 }
  0x3b   :  { %305 = vmatprep.subr.mxu1 %v419_v0 }
  0x3c   :  { %306 = vmatpush3.msra.mxu1 %v150_v14 }
  0x3d   :  { %307 = vmatprep.subr.mxu1 %v419_v0 }
  0x3e   :  { %308 = vmatpush3.msra.mxu1 %v149_v15 }
  0x3f   :  { %309 = vmatprep.subr.mxu1 %v419_v0 }
  0x40   :  { %310 = vmatpush3.msra.mxu1 %v148_v16 }
  0x41   :  { %311 = vmatprep.subr.mxu1 %v419_v0 }
  0x42   :  { %312 = vmatpush3.msra.mxu1 %v147_v17 }
  0x43   :  { %313 = vmatprep.subr.mxu1 %v419_v0 }
  0x44   :  { %314 = vmatpush3.msra.mxu1 %v146_v18 }
  0x45   :  { %315 = vmatprep.subr.mxu1 %v419_v0 }
  0x46   :  { %316 = vmatpush3.msra.mxu1 %v145_v19 }
  0xeb   :  { %v140_v21 = vpop.f32.mrf.mxu0 }
  0xec   :  { %v141_v22 = vadd.f32 %v255_v20, %v140_v21 }
  0xed   :  { %v284_v23 = vpop.f32.mrf.mxu0 }
  0xee   :  { %v144_v24 = vmax.f32 %v141_v22, 0.0 }
  0xf0   :  { %318 = vmatmul.mubr.f32.vlgmr.msra.gmra.mxu1 %v144_v24 }
 0x1b0   :  { %v234_v26 = vpop.f32.mrf.mxu1 }
 0x1b1   :  { %v235_v27 = vadd.f32 %v257_v25, %v234_v26 }
 0x1b2   :  { %v319_v28 = vpop.f32.mrf.mxu1 }
 0x1b3   :  { %238 = vst [vmem:[#allocation8] sm:$0xff] %v235_v27 }
 0x1b4   :  { %399 = shalt.err (!%p396_p5)
}
 0x1b5   :  { %248 = dma.vmem_to_hbm [thread:$0]  %s246_s12, 128, %s475_s5, [#allocation4]  }
 0x1b6   :  { %412 = dma.done.wait [#allocation4], 128  }
 0x1b7   :  { %413 = vsyncadd [#allocation4], 4294967168 }
 0x1b8   :  { %252 = vsyncpa [#allocation3], 1 }
 0x1b9   :  { %253 = vsyncpa [#allocation6], 1 }
 0x1ba   :  { %254 = vsyncpa [#allocation4], 1 }

</bundles_post_ra>
